<compile_context>
chip_gen: v5e
topology: v5e:2x2
jax: 0.10.0
libtpu: 0.0.40
codegen_flags: <defaults>
</compile_context>

<pallas_src>
import jax
import jax.numpy as jnp
from jax.experimental import pallas as pl
from jax.experimental.pallas import tpu as pltpu


_MAX_TILE_ELEMS = 256 * 1024  # ~1 MiB of f32 per (TB, TH, W) block — keeps
                              # pipeline buffers + temporaries well inside the
                              # default scoped VMEM on v5e/v6e/v7x.


def _shift_minus1(a, axis):
    """Array holding a[..., i-1, ...] at index i, zero at index 0."""
    size = a.shape[axis]
    if size == 1:
        return jnp.zeros_like(a)
    idx = jax.lax.broadcasted_iota(jnp.int32, a.shape, axis)
    rolled = pltpu.roll(a, shift=1, axis=axis)          # result[i] = a[i-1]
    return jnp.where(idx == 0, 0.0, rolled)


def _shift_plus1(a, axis):
    """Array holding a[..., i+1, ...] at index i, zero at the last index."""
    size = a.shape[axis]
    if size == 1:
        return jnp.zeros_like(a)
    idx = jax.lax.broadcasted_iota(jnp.int32, a.shape, axis)
    rolled = pltpu.roll(a, shift=size - 1, axis=axis)    # == shift -1: a[i+1]
    return jnp.where(idx == size - 1, 0.0, rolled)


def _sobel_kernel(x_ref, top_ref, bot_ref, out_ref):
    # x_ref   : (TB, TH, W)  current row tile
    # top_ref : (TB, HB, W)  band whose LAST row is the image row above the tile
    # bot_ref : (TB, HB, W)  band whose FIRST row is the image row below the tile
    # out_ref : (TB, TH, W)  gradient magnitude
    i = pl.program_id(1)
    n_i = pl.num_programs(1)
    tb, th, w = out_ref.shape

    x = x_ref[...]

    hb = top_ref.shape[1]
    top_row = top_ref[:, hb - 1:hb, :]               # image row (start - 1) when valid
    bot_row = bot_ref[:, 0:1, :]                     # image row (start + TH) when valid
    top_row = jnp.where(i > 0, top_row, jnp.zeros_like(top_row))      # zero pad at top edge
    bot_row = jnp.where(i < n_i - 1, bot_row, jnp.zeros_like(bot_row))  # zero pad at bottom

    def h_passes(a):
        # Horizontal (lane-axis) separable passes with implicit zero padding.
        a_l = _shift_minus1(a, axis=2)   # value at column c-1
        a_r = _shift_plus1(a, axis=2)    # value at column c+1
        return a_r - a_l, a_l + 2.0 * a + a_r          # (h_diff, h_smooth)

    hd, hs = h_passes(x)                 # (TB, TH, W)
    hd_t, hs_t = h_passes(top_row)       # (TB, 1, W)
    hd_b, hs_b = h_passes(bot_row)       # (TB, 1, W)

    if th == 1:
        hd_up, hs_up, hd_dn, hs_dn = hd_t, hs_t, hd_b, hs_b
    else:
        rows = jax.lax.broadcasted_iota(jnp.int32, x.shape, 1)
        # Row r-1 aligned at r (row 0 taken from the top halo):
        hd_up = jnp.where(rows == 0, hd_t, pltpu.roll(hd, shift=1, axis=1))
        hs_up = jnp.where(rows == 0, hs_t, pltpu.roll(hs, shift=1, axis=1))
        # Row r+1 aligned at r (last row taken from the bottom halo):
        hd_dn = jnp.where(rows == th - 1, hd_b, pltpu.roll(hd, shift=th - 1, axis=1))
        hs_dn = jnp.where(rows == th - 1, hs_b, pltpu.roll(hs, shift=th - 1, axis=1))

    gx = hd_up + 2.0 * hd + hd_dn
    gy = hs_dn - hs_up
    out_ref[...] = jnp.sqrt(gx * gx + gy * gy)


def _pick_row_tile(H, W, max_elems):
    if H % 8 != 0:
        return H                      # small / odd heights: one tile per image
    best = 8
    t = 8
    while t <= H:
        if H % t == 0 and t * W <= max_elems:
            best = t
        t += 8
    return best


def _pick_batch_tile(N, TH, W, max_elems):
    tb = 1
    for d in range(1, N + 1):
        if N % d == 0 and d * TH * W <= max_elems:
            tb = d
    return tb


def sobel_layer(x, *, max_tile_elems=_MAX_TILE_ELEMS):
    """x: (N, 1, H, W) float. Returns (N, 1, H, W) float32 Sobel magnitude."""
    N, C, H, W = x.shape
    assert C == 1, "SobelLayer conv kernels have a single input channel"
    x2d = x.reshape(N, H, W).astype(jnp.float32)

    TH = _pick_row_tile(H, W, max_tile_elems)
    n_row = H // TH
    TB = _pick_batch_tile(N, TH, W, max_tile_elems)
    n_batch = N // TB
    HB = min(8, H)                     # halo-band height
    RB = TH // 8 if TH % 8 == 0 else 0  # band blocks per row tile (unused if n_row==1)

    def x_map(b, i):
        return (b, i, 0)

    def top_map(b, i):
        # band whose last row is (i*TH - 1); clamp to 0 at the top edge (masked).
        return (b, jnp.maximum(i * RB - 1, 0), 0)

    def bot_map(b, i):
        # band whose first row is ((i+1)*TH); use 0 at the bottom edge (masked).
        return (b, jnp.where(i + 1 < n_row, (i + 1) * RB, 0), 0)

    # NOTE: for W < 128 (tiny test images) output stores are lane-masked; real
    # images should keep W (multiple of 128 preferred) on the lane axis.
    out = pl.pallas_call(
        _sobel_kernel,
        out_shape=jax.ShapeDtypeStruct((N, H, W), jnp.float32),
        grid=(n_batch, n_row),
        in_specs=[
            pl.BlockSpec((TB, TH, W), x_map),
            pl.BlockSpec((TB, HB, W), top_map),
            pl.BlockSpec((TB, HB, W), bot_map),
        ],
        out_specs=pl.BlockSpec((TB, TH, W), x_map),
        compiler_params=pltpu.CompilerParams(
            dimension_semantics=("parallel", "parallel")),
    )(x2d, x2d, x2d)

    return out.reshape(N, 1, H, W)


def _sobel_reference(x):
    """Pure-JAX reference via lax.conv (for correctness check)."""
    kx = jnp.array([[-1., 0., 1.], [-2., 0., 2.], [-1., 0., 1.]], jnp.float32)
    ky = jnp.array([[-1., -2., -1.], [0., 0., 0.], [1., 2., 1.]], jnp.float32)
    kx = kx[None, None]
    ky = ky[None, None]
    x = x.astype(jnp.float32)
    gx = jax.lax.conv_general_dilated(x, kx, (1, 1), ((1, 1), (1, 1)),
                                      dimension_numbers=("NCHW", "OIHW", "NCHW"))
    gy = jax.lax.conv_general_dilated(x, ky, (1, 1), ((1, 1), (1, 1)),
                                      dimension_numbers=("NCHW", "OIHW", "NCHW"))
    return jnp.sqrt(gx * gx + gy * gy)


if __name__ == "__main__":
    key = jax.random.PRNGKey(0)

    # Primary check: small image, whole-batch / single row tile path.
    N, C, H, W = 2, 1, 16, 16
    x = jax.random.normal(key, (N, C, H, W), dtype=jnp.float32)
    out = sobel_layer(x)
    jax.block_until_ready(out)
    ref = _sobel_reference(x)
    assert out.shape == (N, C, H, W)
    assert jnp.allclose(out, ref, atol=1e-5, rtol=1e-5)

    # Secondary check: force multiple row tiles + batch tiling to exercise the
    # halo-band path (TH=8, 4 row tiles, 1 image per step).
    N2, H2, W2 = 2, 32, 128
    x2 = jax.random.normal(jax.random.PRNGKey(1), (N2, 1, H2, W2), dtype=jnp.float32)
    out2 = sobel_layer(x2, max_tile_elems=8 * W2)
    jax.block_until_ready(out2)
    ref2 = _sobel_reference(x2)
    assert jnp.allclose(out2, ref2, atol=1e-4, rtol=1e-5)

    print("KERNEL_OK")
</pallas_src>

<mosaic_0001>
module attributes {stable_mosaic.version = 11 : i64} {
  func.func @_sobel_kernel(%arg0: i32, %arg1: i32, %arg2: memref<2x16x16xf32, #tpu.memory_space<vmem>>, %arg3: memref<2x8x16xf32, #tpu.memory_space<vmem>>, %arg4: memref<2x8x16xf32, #tpu.memory_space<vmem>>, %arg5: memref<2x16x16xf32, #tpu.memory_space<vmem>>) attributes {dimension_semantics = [#tpu.dimension_semantics<parallel>, #tpu.dimension_semantics<parallel>], iteration_bounds = array<i64: 1, 1>, scalar_prefetch = 0 : i64, scratch_operands = 0 : i64, tpu.core_type = #tpu.core_type<tc>, window_params = [{transform_indices = @transform_0, window_bounds = array<i64: 2, 16, 16>}, {transform_indices = @transform_1, window_bounds = array<i64: 2, 8, 16>}, {transform_indices = @transform_2, window_bounds = array<i64: 2, 8, 16>}, {transform_indices = @transform_3, window_bounds = array<i64: 2, 16, 16>}]} {
    %c0 = arith.constant 0 : index
    %c0_0 = arith.constant 0 : index
    %c0_1 = arith.constant 0 : index
    %0 = vector.load %arg2[%c0, %c0_0, %c0_1] : memref<2x16x16xf32, #tpu.memory_space<vmem>>, vector<2x16x16xf32>
    %c0_2 = arith.constant 0 : index
    %c7 = arith.constant 7 : index
    %c0_3 = arith.constant 0 : index
    %1 = vector.load %arg3[%c0_2, %c7, %c0_3] : memref<2x8x16xf32, #tpu.memory_space<vmem>>, vector<2x1x16xf32>
    %c0_4 = arith.constant 0 : index
    %c0_5 = arith.constant 0 : index
    %c0_6 = arith.constant 0 : index
    %2 = vector.load %arg4[%c0_4, %c0_5, %c0_6] : memref<2x8x16xf32, #tpu.memory_space<vmem>>, vector<2x1x16xf32>
    %c0_i32 = arith.constant 0 : i32
    %3 = arith.cmpi sgt, %arg1, %c0_i32 : i32
    %cst = arith.constant 0.000000e+00 : f32
    %4 = vector.broadcast %cst : f32 to vector<2x1x16xf32>
    %5 = arith.select %3, %1, %4 : vector<2x1x16xf32>
    %c0_i32_7 = arith.constant 0 : i32
    %6 = arith.cmpi slt, %arg1, %c0_i32_7 : i32
    %cst_8 = arith.constant 0.000000e+00 : f32
    %7 = vector.broadcast %cst_8 : f32 to vector<2x1x16xf32>
    %8 = arith.select %6, %2, %7 : vector<2x1x16xf32>
    %9 = tpu.iota {dimensions = array<i32: 2>} : vector<2x16x16xi32>
    %c1_i32 = arith.constant 1 : i32
    %10 = tpu.dynamic_rotate %0 by %c1_i32 dim 2 : vector<2x16x16xf32>, i32 -> vector<2x16x16xf32>
    %c0_i32_9 = arith.constant 0 : i32
    %11 = vector.broadcast %c0_i32_9 : i32 to vector<2x16x16xi32>
    %12 = arith.cmpi eq, %9, %11 : vector<2x16x16xi32>
    %cst_10 = arith.constant 0.000000e+00 : f32
    %13 = vector.broadcast %cst_10 : f32 to vector<2x16x16xf32>
    %14 = arith.select %12, %13, %10 : vector<2x16x16xi1>, vector<2x16x16xf32>
    %15 = tpu.iota {dimensions = array<i32: 2>} : vector<2x16x16xi32>
    %c15_i32 = arith.constant 15 : i32
    %16 = tpu.dynamic_rotate %0 by %c15_i32 dim 2 : vector<2x16x16xf32>, i32 -> vector<2x16x16xf32>
    %c15_i32_11 = arith.constant 15 : i32
    %17 = vector.broadcast %c15_i32_11 : i32 to vector<2x16x16xi32>
    %18 = arith.cmpi eq, %15, %17 : vector<2x16x16xi32>
    %cst_12 = arith.constant 0.000000e+00 : f32
    %19 = vector.broadcast %cst_12 : f32 to vector<2x16x16xf32>
    %20 = arith.select %18, %19, %16 : vector<2x16x16xi1>, vector<2x16x16xf32>
    %21 = arith.subf %20, %14 : vector<2x16x16xf32>
    %cst_13 = arith.constant 2.000000e+00 : f32
    %22 = vector.broadcast %cst_13 : f32 to vector<2x16x16xf32>
    %23 = arith.mulf %22, %0 : vector<2x16x16xf32>
    %24 = arith.addf %14, %23 : vector<2x16x16xf32>
    %25 = arith.addf %24, %20 : vector<2x16x16xf32>
    %26 = tpu.iota {dimensions = array<i32: 2>} : vector<2x1x16xi32>
    %c1_i32_14 = arith.constant 1 : i32
    %27 = tpu.dynamic_rotate %5 by %c1_i32_14 dim 2 : vector<2x1x16xf32>, i32 -> vector<2x1x16xf32>
    %c0_i32_15 = arith.constant 0 : i32
    %28 = vector.broadcast %c0_i32_15 : i32 to vector<2x1x16xi32>
    %29 = arith.cmpi eq, %26, %28 : vector<2x1x16xi32>
    %cst_16 = arith.constant 0.000000e+00 : f32
    %30 = vector.broadcast %cst_16 : f32 to vector<2x1x16xf32>
    %31 = arith.select %29, %30, %27 : vector<2x1x16xi1>, vector<2x1x16xf32>
    %32 = tpu.iota {dimensions = array<i32: 2>} : vector<2x1x16xi32>
    %c15_i32_17 = arith.constant 15 : i32
    %33 = tpu.dynamic_rotate %5 by %c15_i32_17 dim 2 : vector<2x1x16xf32>, i32 -> vector<2x1x16xf32>
    %c15_i32_18 = arith.constant 15 : i32
    %34 = vector.broadcast %c15_i32_18 : i32 to vector<2x1x16xi32>
    %35 = arith.cmpi eq, %32, %34 : vector<2x1x16xi32>
    %cst_19 = arith.constant 0.000000e+00 : f32
    %36 = vector.broadcast %cst_19 : f32 to vector<2x1x16xf32>
    %37 = arith.select %35, %36, %33 : vector<2x1x16xi1>, vector<2x1x16xf32>
    %38 = arith.subf %37, %31 : vector<2x1x16xf32>
    %cst_20 = arith.constant 2.000000e+00 : f32
    %39 = vector.broadcast %cst_20 : f32 to vector<2x1x16xf32>
    %40 = arith.mulf %39, %5 : vector<2x1x16xf32>
    %41 = arith.addf %31, %40 : vector<2x1x16xf32>
    %42 = arith.addf %41, %37 : vector<2x1x16xf32>
    %43 = tpu.iota {dimensions = array<i32: 2>} : vector<2x1x16xi32>
    %c1_i32_21 = arith.constant 1 : i32
    %44 = tpu.dynamic_rotate %8 by %c1_i32_21 dim 2 : vector<2x1x16xf32>, i32 -> vector<2x1x16xf32>
    %c0_i32_22 = arith.constant 0 : i32
    %45 = vector.broadcast %c0_i32_22 : i32 to vector<2x1x16xi32>
    %46 = arith.cmpi eq, %43, %45 : vector<2x1x16xi32>
    %cst_23 = arith.constant 0.000000e+00 : f32
    %47 = vector.broadcast %cst_23 : f32 to vector<2x1x16xf32>
    %48 = arith.select %46, %47, %44 : vector<2x1x16xi1>, vector<2x1x16xf32>
    %49 = tpu.iota {dimensions = array<i32: 2>} : vector<2x1x16xi32>
    %c15_i32_24 = arith.constant 15 : i32
    %50 = tpu.dynamic_rotate %8 by %c15_i32_24 dim 2 : vector<2x1x16xf32>, i32 -> vector<2x1x16xf32>
    %c15_i32_25 = arith.constant 15 : i32
    %51 = vector.broadcast %c15_i32_25 : i32 to vector<2x1x16xi32>
    %52 = arith.cmpi eq, %49, %51 : vector<2x1x16xi32>
    %cst_26 = arith.constant 0.000000e+00 : f32
    %53 = vector.broadcast %cst_26 : f32 to vector<2x1x16xf32>
    %54 = arith.select %52, %53, %50 : vector<2x1x16xi1>, vector<2x1x16xf32>
    %55 = arith.subf %54, %48 : vector<2x1x16xf32>
    %cst_27 = arith.constant 2.000000e+00 : f32
    %56 = vector.broadcast %cst_27 : f32 to vector<2x1x16xf32>
    %57 = arith.mulf %56, %8 : vector<2x1x16xf32>
    %58 = arith.addf %48, %57 : vector<2x1x16xf32>
    %59 = arith.addf %58, %54 : vector<2x1x16xf32>
    %60 = tpu.iota {dimensions = array<i32: 1>} : vector<2x16x16xi32>
    %c0_i32_28 = arith.constant 0 : i32
    %61 = vector.broadcast %c0_i32_28 : i32 to vector<2x16x16xi32>
    %62 = arith.cmpi eq, %60, %61 : vector<2x16x16xi32>
    %c1_i32_29 = arith.constant 1 : i32
    %63 = tpu.dynamic_rotate %21 by %c1_i32_29 dim 1 : vector<2x16x16xf32>, i32 -> vector<2x16x16xf32>
    %64 = vector.shape_cast %38 : vector<2x1x16xf32> to vector<2x1x16xf32>
    %65 = vector.broadcast %64 : vector<2x1x16xf32> to vector<2x16x16xf32>
    %66 = arith.select %62, %65, %63 : vector<2x16x16xi1>, vector<2x16x16xf32>
    %c0_i32_30 = arith.constant 0 : i32
    %67 = vector.broadcast %c0_i32_30 : i32 to vector<2x16x16xi32>
    %68 = arith.cmpi eq, %60, %67 : vector<2x16x16xi32>
    %c1_i32_31 = arith.constant 1 : i32
    %69 = tpu.dynamic_rotate %25 by %c1_i32_31 dim 1 : vector<2x16x16xf32>, i32 -> vector<2x16x16xf32>
    %70 = vector.shape_cast %42 : vector<2x1x16xf32> to vector<2x1x16xf32>
    %71 = vector.broadcast %70 : vector<2x1x16xf32> to vector<2x16x16xf32>
    %72 = arith.select %68, %71, %69 : vector<2x16x16xi1>, vector<2x16x16xf32>
    %c15_i32_32 = arith.constant 15 : i32
    %73 = vector.broadcast %c15_i32_32 : i32 to vector<2x16x16xi32>
    %74 = arith.cmpi eq, %60, %73 : vector<2x16x16xi32>
    %c15_i32_33 = arith.constant 15 : i32
    %75 = tpu.dynamic_rotate %21 by %c15_i32_33 dim 1 : vector<2x16x16xf32>, i32 -> vector<2x16x16xf32>
    %76 = vector.shape_cast %55 : vector<2x1x16xf32> to vector<2x1x16xf32>
    %77 = vector.broadcast %76 : vector<2x1x16xf32> to vector<2x16x16xf32>
    %78 = arith.select %74, %77, %75 : vector<2x16x16xi1>, vector<2x16x16xf32>
    %c15_i32_34 = arith.constant 15 : i32
    %79 = vector.broadcast %c15_i32_34 : i32 to vector<2x16x16xi32>
    %80 = arith.cmpi eq, %60, %79 : vector<2x16x16xi32>
    %c15_i32_35 = arith.constant 15 : i32
    %81 = tpu.dynamic_rotate %25 by %c15_i32_35 dim 1 : vector<2x16x16xf32>, i32 -> vector<2x16x16xf32>
    %82 = vector.shape_cast %59 : vector<2x1x16xf32> to vector<2x1x16xf32>
    %83 = vector.broadcast %82 : vector<2x1x16xf32> to vector<2x16x16xf32>
    %84 = arith.select %80, %83, %81 : vector<2x16x16xi1>, vector<2x16x16xf32>
    %cst_36 = arith.constant 2.000000e+00 : f32
    %85 = vector.broadcast %cst_36 : f32 to vector<2x16x16xf32>
    %86 = arith.mulf %85, %21 : vector<2x16x16xf32>
    %87 = arith.addf %66, %86 : vector<2x16x16xf32>
    %88 = arith.addf %87, %78 : vector<2x16x16xf32>
    %89 = arith.subf %84, %72 : vector<2x16x16xf32>
    %90 = arith.mulf %88, %88 : vector<2x16x16xf32>
    %91 = arith.mulf %89, %89 : vector<2x16x16xf32>
    %92 = arith.addf %90, %91 : vector<2x16x16xf32>
    %93 = math.sqrt %92 : vector<2x16x16xf32>
    %c0_37 = arith.constant 0 : index
    %c0_38 = arith.constant 0 : index
    %c0_39 = arith.constant 0 : index
    %94 = vector.load %arg5[%c0_37, %c0_38, %c0_39] : memref<2x16x16xf32, #tpu.memory_space<vmem>>, vector<2x16x16xf32>
    tpu.vector_store %arg5[%c0_37, %c0_38, %c0_39], %93 {strides = array<i32>} : memref<2x16x16xf32, #tpu.memory_space<vmem>>, vector<2x16x16xf32>,
    return
  }
  func.func @transform_0(%arg0: i32, %arg1: i32) -> (i32, i32, i32) {
    %c0_i32 = arith.constant 0 : i32
    %c0_i32_0 = arith.constant 0 : i32
    return %arg0, %arg1, %c0_i32 : i32, i32, i32
  }
  func.func @transform_1(%arg0: i32, %arg1: i32) -> (i32, i32, i32) {
    %c2_i32 = arith.constant 2 : i32
    %0 = arith.muli %arg1, %c2_i32 : i32
    %c1_i32 = arith.constant 1 : i32
    %1 = arith.subi %0, %c1_i32 : i32
    %c0_i32 = arith.constant 0 : i32
    %2 = arith.maxsi %1, %c0_i32 : i32
    %c0_i32_0 = arith.constant 0 : i32
    %c0_i32_1 = arith.constant 0 : i32
    return %arg0, %2, %c0_i32_0 : i32, i32, i32
  }
  func.func @transform_2(%arg0: i32, %arg1: i32) -> (i32, i32, i32) {
    %c1_i32 = arith.constant 1 : i32
    %0 = arith.addi %arg1, %c1_i32 : i32
    %c1_i32_0 = arith.constant 1 : i32
    %1 = arith.cmpi slt, %0, %c1_i32_0 : i32
    %c1_i32_1 = arith.constant 1 : i32
    %2 = arith.addi %arg1, %c1_i32_1 : i32
    %c2_i32 = arith.constant 2 : i32
    %3 = arith.muli %2, %c2_i32 : i32
    %c0_i32 = arith.constant 0 : i32
    %4 = arith.select %1, %3, %c0_i32 : i32
    %c0_i32_2 = arith.constant 0 : i32
    %c0_i32_3 = arith.constant 0 : i32
    return %arg0, %4, %c0_i32_2 : i32, i32, i32
  }
  func.func @transform_3(%arg0: i32, %arg1: i32) -> (i32, i32, i32) {
    %c0_i32 = arith.constant 0 : i32
    %c0_i32_0 = arith.constant 0 : i32
    return %arg0, %arg1, %c0_i32 : i32, i32, i32
  }
}

</mosaic_0001>

<bundles_post_ra>
// kernel: tpu_custom_call.1
= control target key start
LH: loop header
LB: loop body
LE: loop exit
PB: predicated region body
PF: predicated region fallthrough
CT: control target
= control target key end

     0   :  { %8 = vsyncpa [#allocation3], 0  ;;  %s827_s0 = inlined_call_operand.hbm [shape: f32[2,16,16], index: 0, kind: input, shape index: {}]   ;;  %s828_s1 = inlined_call_operand.hbm [shape: f32[2,16,16], index: 1, kind: input, shape index: {}]   ;;  %s829_s2 = inlined_call_operand.hbm [shape: f32[2,16,16], index: 2, kind: input, shape index: {}]   ;;  %s830_s3 = inlined_call_operand.hbm [shape: f32[2,16,16], index: 3, kind: output, shape index: {}]  }
   0x1   :  { %9 = vsyncpa [#allocation6], 0 }
   0x2   :  { %10 = vsyncpa [#allocation4], 0  ;;  %s34_s14 = sshll.u32 %s828_s1, 4  ;;  %s590_s15 = smov [#allocation5]   ;;  %s35_s14 = int_to_ptr.hbm [resolvable:$true] %s34_s14 }
   0x3   :  { %s36_s16 = sshll.u32 %s590_s15, 4  ;;  %s591_s17 = smov 256   ;;  %s37_s16 = int_to_ptr.vmem [resolvable:$true] %s36_s16 }
   0x4   :  { %s592_s18 = smov 128   ;;  %s593_s19 = smov 8  }
   0x5   :  { %42 = dma.hbm_to_vmem [thread:$0]  %s35_s14, 256, %s37_s16, [#allocation6], %s591_s17, %s592_s18, %s593_s19  }
   0x6   :  { %s15_s22 = sshll.u32 %s827_s0, 4  ;;  %s594_s23 = smov [#allocation2]   ;;  %s16_s22 = int_to_ptr.hbm [resolvable:$true] %s15_s22 }
   0x7   :  { %s17_s24 = sshll.u32 %s594_s23, 4  ;;  %s53_s26 = sshll.u32 %s829_s2, 4  ;;  %s18_s24 = int_to_ptr.vmem [resolvable:$true] %s17_s24  ;;  %s54_s26 = int_to_ptr.hbm [resolvable:$true] %s53_s26 }
   0x8   :  { %23 = dma.hbm_to_vmem [thread:$0]  %s16_s22, 512, %s18_s24, [#allocation3], %s592_s18, %s592_s18, %s593_s19  }
   0x9   :  { %s595_s27 = smov [#allocation7]  }
   0xa   :  { %s55_s28 = sshll.u32 %s595_s27, 4  ;;  %s56_s28 = int_to_ptr.vmem [resolvable:$true] %s55_s28 }
   0xb   :  { %61 = dma.hbm_to_vmem [thread:$0]  %s54_s26, 256, %s56_s28, [#allocation6], %s591_s17, %s592_s18, %s593_s19  }
   0xc   :  { %584 = dma.done.wait [#allocation3], 512  }
   0xd   :  { %585 = vsyncadd [#allocation3], 4294966784 }
   0xe   :  { %586 = dma.done.wait [#allocation6], 512  }
   0xf   :  { %587 = vsyncadd [#allocation6], 4294966784  ;;  %v596_v0 = vmov 0.0   ;;  %s597_s0 = smov 16   ;;  %v638_v1 = vld [vmem:[#allocation2 + $0x10] sm:$0xff]  ;;  %v640_v2 = vld [vmem:[#allocation2] sm:$0xff]  ;;  %v102_v47 = vlaneseq }
  0x10   :  { %441 = vrot.lane.b32.xlu2 %v596_v0, %s597_s0  ;;  %111 = vrot.lane.b32.xlu1 %v638_v1, %s597_s0  ;;  %v647_v3 = vld [vmem:[#allocation2 + $0x18] sm:$0xff]  ;;  %v649_v4 = vld [vmem:[#allocation2 + $0x8] sm:$0xff]  ;;  %vm104_vm0 = vcmask 1047680   ;;  %s598_s2 = smov 113   ;;  %s599_s29 = smov 127   ;;  %v171_v54 = vmul.f32 2.0, %v640_v2 }
  0x11   :  { %105 = vrot.lane.b32.xlu0 %v640_v2, %s597_s0  ;;  %v685_v49 = vand.u32 127, %v102_v47  ;;  %v172_v52 = vmul.f32 2.0, %v649_v4  ;;  %v690_v53 = vshrl.u32 %v102_v47, 7  ;;  %v173_v55 = vmul.f32 2.0, %v638_v1  ;;  %s600_s30 = smov [#allocation8]   ;;  %s411_s7 = sshll.u32 %s830_s3, 4  ;;  %s412_s7 = int_to_ptr.hbm [resolvable:$true] %s411_s7 }
  0x12   :  { %vm400_vm9 = vcmask 130048   ;;  %s409_s4 = sshll.u32 %s600_s30, 4  ;;  %s410_s4 = int_to_ptr.vmem [resolvable:$true] %s409_s4 }
  0x13   :  { %vm129_vm1 = vcmp.eq.s32.totalorder %v685_v49, 0  ;;  %vm150_vm2 = vcmp.eq.s32.totalorder %v685_v49, 15  ;;  %vm268_vm3 = vcmp.lt.s32.totalorder %v690_v53, 1  ;;  %vm299_vm4 = vcmp.lt.s32.totalorder %v690_v53, 7 }
  0x14   :  { %vm262_vm5 = vcmp.eq.s32.totalorder %v690_v53, 0 }
  0x18   :  { %446 = vrot.lane.b32.xlu2 %v596_v0, %s597_s0  ;;  %114 = vrot.lane.b32.xlu1 %v647_v3, %s597_s0 }
  0x19   :  { %108 = vrot.lane.b32.xlu0 %v649_v4, %s597_s0 }
  0x6a   :  { %v442_v5 = vpop.permute.xlu2 %441 }
  0x6b   :  { %v444_v15 = vunpack.i.h.bf16 %v442_v5  ;;  %v443_v16 = vunpack.i.l.bf16 %v442_v5 }
  0x6d   :  { %v185_v22 = vsel %vm104_vm0, %v443_v16, 0.0  ;;  %v188_v23 = vsel %vm104_vm0, %v444_v15, 0.0 }
  0x6e   :  { %v450_v24 = vpack.i.bf16 %v188_v23, %v185_v22 }
  0x72   :  { %v447_v6 = vpop.permute.xlu2 %446 }
  0x73   :  { %v449_v9 = vunpack.i.h.bf16 %v447_v6  ;;  %v448_v10 = vunpack.i.l.bf16 %v447_v6 }
  0x75   :  { %v223_v13 = vsel %vm104_vm0, %v448_v10, 0.0  ;;  %v226_v14 = vsel %vm104_vm0, %v449_v9, 0.0 }
  0x76   :  { %v455_v17 = vpack.i.bf16 %v226_v14, %v223_v13 }
  0x82   :  { %v112_v7 = vpop.permute.xlu1 %111 }
  0x83   :  { %v106_v8 = vpop.permute.xlu0 %105  ;;  %v113_v12 = vsel %vm104_vm0, %v112_v7, %v638_v1 }
  0x84   :  { %v107_v11 = vsel %vm104_vm0, %v106_v8, %v640_v2  ;;  %121 = vrot.lane.b32.xlu2 %v113_v12, %s597_s0 }
  0x85   :  { %117 = vrot.lane.b32.xlu0 %v107_v11, %s597_s0 }
  0x8a   :  { %v115_v18 = vpop.permute.xlu1 %114 }
  0x8b   :  { %v109_v19 = vpop.permute.xlu0 %108  ;;  %v116_v20 = vsel %vm104_vm0, %v115_v18, %v647_v3 }
  0x8c   :  { %v110_v21 = vsel %vm104_vm0, %v109_v19, %v649_v4  ;;  %456 = vrot.lane.b32.xlu2 %v455_v17, %s597_s0  ;;  %v725_v19 = vadd.s32 8, %v690_v53 }
  0x8d   :  { %123 = vrot.lane.b32.xlu0 %v116_v20, %s597_s0  ;;  %119 = vrot.lane.b32.xlu1 %v110_v21, %s597_s0 }
  0x8e   :  { %vm294_vm6 = vcmp.eq.s32.totalorder %v725_v19, 15 }
  0x95   :  { %451 = vrot.lane.b32.xlu1 %v450_v24, %s597_s0 }
  0xde   :  { %v122_v31 = vpop.permute.xlu2 %121 }
  0xdf   :  { %v127_v35 = vsel %vm104_vm0, %v122_v31, %v638_v1  ;;  %v174_v1 = vmul.f32 2.0, %v647_v3 }
  0xe6   :  { %v457_v39 = vpop.permute.xlu2 %456 }
  0xe7   :  { %v459_v40 = vunpack.i.h.bf16 %v457_v39  ;;  %v458_v41 = vunpack.i.l.bf16 %v457_v39 }
  0xe9   :  { %v232_v42 = vsel %vm104_vm0, %v459_v40, 0.0  ;;  %v231_v43 = vsel %vm104_vm0, %v458_v41, 0.0 }
  0xea   :  { %v470_v44 = vpack.i.bf16 %v232_v42, %v231_v43 }
  0xf7   :  { %v118_v25 = vpop.permute.xlu0 %117 }
  0xf8   :  { %v125_v26 = vsel %vm104_vm0, %v118_v25, %v640_v2 }
  0xf9   :  { %134 = vrot.lane.b32.xlu0 %v125_v26, %s598_s2 }
  0xff   :  { %v120_v27 = vpop.permute.xlu1 %119  ;;  %v124_v28 = vpop.permute.xlu0 %123 }
 0x100   :  { %v126_v29 = vsel %vm104_vm0, %v120_v27, %v649_v4  ;;  %v128_v30 = vsel %vm104_vm0, %v124_v28, %v647_v3 }
 0x101   :  { %136 = vrot.lane.b32.xlu1 %v126_v29, %s598_s2  ;;  %140 = vrot.lane.b32.xlu0 %v128_v30, %s598_s2 }
 0x107   :  { %v452_v32 = vpop.permute.xlu1 %451 }
 0x108   :  { %v454_v33 = vunpack.i.h.bf16 %v452_v32  ;;  %v453_v34 = vunpack.i.l.bf16 %v452_v32 }
 0x109   :  { %151 = vrot.lane.b32.xlu1 %v125_v26, %s599_s29  ;;  %155 = vrot.lane.b32.xlu0 %v127_v35, %s599_s29 }
 0x10a   :  { %v194_v36 = vsel %vm104_vm0, %v454_v33, 0.0  ;;  %v193_v37 = vsel %vm104_vm0, %v453_v34, 0.0 }
 0x10b   :  { %v460_v38 = vpack.i.bf16 %v194_v36, %v193_v37 }
 0x10d   :  { %461 = vrot.lane.b32.xlu2 %v460_v38, %s598_s2 }
 0x111   :  { %157 = vrot.lane.b32.xlu1 %v128_v30, %s599_s29  ;;  %466 = vrot.lane.b32.xlu0 %v460_v38, %s599_s29 }
 0x115   :  { %138 = vrot.lane.b32.xlu2 %v127_v35, %s598_s2 }
 0x119   :  { %471 = vrot.lane.b32.xlu1 %v470_v44, %s598_s2 }
 0x11d   :  { %153 = vrot.lane.b32.xlu2 %v126_v29, %s599_s29 }
 0x125   :  { %476 = vrot.lane.b32.xlu2 %v470_v44, %s599_s29 }
 0x167   :  { %v462_v45 = vpop.permute.xlu2 %461 }
 0x168   :  { %v464_v61 = vunpack.i.h.bf16 %v462_v45  ;;  %v463_v62 = vunpack.i.l.bf16 %v462_v45 }
 0x16a   :  { %v204_v12 = vsel %vm129_vm1, 0.0, %v464_v61  ;;  %v719_v13 = vsel %vm129_vm1, 0.0, %v463_v62 }
 0x16b   :  { %v135_v46 = vpop.permute.xlu0 %134 }
 0x16c   :  { %v146_v58 = vsel %vm129_vm1, 0.0, %v135_v46 }
 0x16d   :  { %v175_v0 = vadd.f32 %v171_v54, %v146_v58 }
 0x16f   :  { %v139_v48 = vpop.permute.xlu2 %138 }
 0x170   :  { %v148_v59 = vsel %vm129_vm1, 0.0, %v139_v48 }
 0x171   :  { %v177_v2 = vadd.f32 %v173_v55, %v148_v59 }
 0x173   :  { %v137_v50 = vpop.permute.xlu1 %136  ;;  %v141_v51 = vpop.permute.xlu0 %140 }
 0x174   :  { %v147_v56 = vsel %vm129_vm1, 0.0, %v137_v50  ;;  %v149_v10 = vsel %vm129_vm1, 0.0, %v141_v51 }
 0x175   :  { %v176_v63 = vadd.f32 %v172_v52, %v147_v56  ;;  %v178_v20 = vadd.f32 %v174_v1, %v149_v10 }
 0x177   :  { %v154_v57 = vpop.permute.xlu2 %153 }
 0x178   :  { %v164_v60 = vsel %vm150_vm2, 0.0, %v154_v57 }
 0x179   :  { %v168_v6 = vsub.f32 %v164_v60, %v147_v56  ;;  %v704_v7 = vadd.f32 %v176_v63, %v164_v60 }
 0x17b   :  { %v152_v4 = vpop.permute.xlu1 %151  ;;  %v156_v5 = vpop.permute.xlu0 %155  ;;  %v266_v21 = vrot.slane %v168_v6, 7  ;;  %v281_v22 = vrot.slane %v704_v7, 7  ;;  %v297_v24 = vrot.slane %v168_v6, 1  ;;  %v312_v25 = vrot.slane %v704_v7, 1 }
 0x17c   :  { %v163_v8 = vsel %vm150_vm2, 0.0, %v152_v4  ;;  %v165_v9 = vsel %vm150_vm2, 0.0, %v156_v5  ;;  %v325_v26 = vmul.f32 2.0, %v168_v6 }
 0x17d   :  { %v167_v11 = vsub.f32 %v163_v8, %v146_v58  ;;  %v713_v3 = vadd.f32 %v175_v0, %v163_v8  ;;  %v169_v14 = vsub.f32 %v165_v9, %v148_v59  ;;  %v721_v15 = vadd.f32 %v177_v2, %v165_v9 }
 0x17f   :  { %v264_v16 = vrot.slane %v167_v11, 7  ;;  %v279_v17 = vrot.slane %v713_v3, 7  ;;  %v295_v18 = vrot.slane %v167_v11, 1  ;;  %v310_v23 = vrot.slane %v713_v3, 1  ;;  %v477_v32 = vpop.permute.xlu2 %476 }
 0x180   :  { %v324_v27 = vmul.f32 2.0, %v167_v11  ;;  %v265_v29 = vrot.slane %v169_v14, 7  ;;  %v280_v30 = vrot.slane %v721_v15, 7  ;;  %v296_v31 = vrot.slane %v169_v14, 1 }
 0x181   :  { %v269_v28 = vsel %vm268_vm3, %v264_v16, %v266_v21  ;;  %v271_v33 = vsel %vm268_vm3, %v266_v21, %v264_v16  ;;  %v285_v34 = vsel %vm268_vm3, %v281_v22, %v279_v17  ;;  %v300_v35 = vsel %vm299_vm4, %v295_v18, %v297_v24 }
 0x182   :  { %v746_v36 = vsel %vm299_vm4, %v297_v24, %v295_v18  ;;  %v314_v39 = vsel %vm299_vm4, %v310_v23, %v312_v25  ;;  %v479_v43 = vunpack.i.h.bf16 %v477_v32  ;;  %v478_v44 = vunpack.i.l.bf16 %v477_v32 }
 0x183   :  { %v158_v37 = vpop.permute.xlu1 %157  ;;  %v467_v38 = vpop.permute.xlu0 %466  ;;  %v311_v47 = vrot.slane %v721_v15, 1  ;;  %v326_v48 = vmul.f32 2.0, %v169_v14  ;;  %v329_v56 = vadd.f32 %v325_v26, %v269_v28 }
 0x184   :  { %v166_v40 = vsel %vm150_vm2, 0.0, %v158_v37  ;;  %v469_v41 = vunpack.i.h.bf16 %v467_v38  ;;  %v468_v42 = vunpack.i.l.bf16 %v467_v38  ;;  %v250_v61 = vsel %vm150_vm2, 0.0, %v479_v43 }
 0x185   :  { %v170_v45 = vsub.f32 %v166_v40, %v149_v10  ;;  %v182_v46 = vadd.f32 %v178_v20, %v166_v40  ;;  %v249_v62 = vsel %vm150_vm2, 0.0, %v478_v44 }
 0x186   :  { %v212_v50 = vsel %vm150_vm2, 0.0, %v469_v41  ;;  %v211_v51 = vsel %vm150_vm2, 0.0, %v468_v42 }
 0x187   :  { %v267_v52 = vrot.slane %v170_v45, 7  ;;  %v282_v54 = vrot.slane %v182_v46, 7  ;;  %v298_v55 = vrot.slane %v170_v45, 1  ;;  %v313_v57 = vrot.slane %v182_v46, 1 }
 0x188   :  { %v214_v58 = vsub.f32 %v212_v50, %v204_v12  ;;  %v220_v59 = vadd.f32 %v212_v50, %v204_v12  ;;  %v213_v60 = vsub.f32 %v211_v51, %v719_v13  ;;  %v327_v0 = vmul.f32 2.0, %v170_v45 }
 0x189   :  { %v270_v63 = vsel %vm268_vm3, %v265_v29, %v267_v52  ;;  %v272_v2 = vsel %vm268_vm3, %v267_v52, %v265_v29  ;;  %v284_v1 = vsel %vm268_vm3, %v280_v30, %v282_v54  ;;  %v286_v4 = vsel %vm268_vm3, %v282_v54, %v280_v30 }
 0x18a   :  { %v301_v5 = vsel %vm299_vm4, %v296_v31, %v298_v55  ;;  %v303_v6 = vsel %vm299_vm4, %v298_v55, %v296_v31  ;;  %v274_v8 = vperm.slane %v214_v58, 0  ;;  %v288_v9 = vperm.slane %v220_v59, 0 }
 0x18b   :  { %v219_v10 = vadd.f32 %v211_v51, %v719_v13  ;;  %v472_v11 = vpop.permute.xlu1 %471  ;;  %v315_v12 = vsel %vm299_vm4, %v311_v47, %v313_v57  ;;  %v273_v14 = vperm.slane %v213_v60, 0  ;;  %v317_v18 = vsel %vm299_vm4, %v313_v57, %v311_v47 }
 0x18c   :  { %v474_v15 = vunpack.i.h.bf16 %v472_v11  ;;  %v473_v16 = vunpack.i.l.bf16 %v472_v11  ;;  %v277_v20 = vsel %vm262_vm5, %v274_v8, %v272_v2  ;;  %v291_v21 = vsel %vm262_vm5, %v288_v9, %v286_v4 }
 0x18d   :  { %v287_v24 = vperm.slane %v219_v10, 0  ;;  %v330_v26 = vadd.f32 %v326_v48, %v277_v20  ;;  %v338_v28 = vsub.f32 %v315_v12, %v291_v21  ;;  %v275_v13 = vsel %vm262_vm5, %v273_v14, %v271_v33 }
 0x18e   :  { %v242_v29 = vsel %vm129_vm1, 0.0, %v474_v15  ;;  %v328_v31 = vadd.f32 %v324_v27, %v275_v13  ;;  %v331_v38 = vadd.f32 %v327_v0, %v270_v63  ;;  %v241_v42 = vsel %vm129_vm1, 0.0, %v473_v16 }
 0x18f   :  { %v289_v30 = vsel %vm262_vm5, %v287_v24, %v285_v34  ;;  %v252_v32 = vsub.f32 %v250_v61, %v242_v29  ;;  %v258_v37 = vadd.f32 %v250_v61, %v242_v29  ;;  %v334_v40 = vadd.f32 %v330_v26, %v301_v5 }
 0x190   :  { %v336_v41 = vsub.f32 %v314_v39, %v289_v30  ;;  %v332_v43 = vadd.f32 %v328_v31, %v300_v35  ;;  %v251_v46 = vsub.f32 %v249_v62, %v241_v42  ;;  %v346_v47 = vmul.f32 %v338_v28, %v338_v28 }
 0x191   :  { %v305_v44 = vperm.slane %v252_v32, 0  ;;  %v319_v45 = vperm.slane %v258_v37, 0  ;;  %v342_v33 = vmul.f32 %v334_v40, %v334_v40  ;;  %v257_v50 = vadd.f32 %v249_v62, %v241_v42 }
 0x192   :  { %v344_v48 = vmul.f32 %v336_v41, %v336_v41  ;;  %v340_v51 = vmul.f32 %v332_v43, %v332_v43  ;;  %v304_v52 = vperm.slane %v251_v46, 0  ;;  %v283_v35 = vsel %vm268_vm3, %v279_v17, %v281_v22 }
 0x193   :  { %v309_v27 = vsel %vm294_vm6, %v305_v44, %v303_v6  ;;  %v323_v34 = vsel %vm294_vm6, %v319_v45, %v317_v18  ;;  %v350_v39 = vadd.f32 %v346_v47, %v342_v33  ;;  %v318_v54 = vperm.slane %v257_v50, 0 }
 0x194   :  { %v335_v49 = vadd.f32 %v331_v38, %v309_v27  ;;  %v339_v55 = vsub.f32 %v323_v34, %v284_v1  ;;  %v316_v57 = vsel %vm299_vm4, %v312_v25, %v310_v23  ;;  %v348_v58 = vadd.f32 %v344_v48, %v340_v51 }
 0x195   :  { %v307_v59 = vsel %vm294_vm6, %v304_v52, %v746_v36  ;;  %480 = vrsqrt.f32 %v350_v39  ;;  %v321_v60 = vsel %vm294_vm6, %v318_v54, %v316_v57  ;;  %vm383_vm10 = vcmp.eq.f32.partialorder %v350_v39, inf }
 0x196   :  { %v333_v61 = vadd.f32 %v329_v56, %v307_v59  ;;  %v343_v62 = vmul.f32 %v335_v49, %v335_v49  ;;  %482 = vrsqrt.f32 %v348_v58  ;;  %v337_v17 = vsub.f32 %v321_v60, %v283_v35 }
 0x197   :  { %v347_v22 = vmul.f32 %v339_v55, %v339_v55  ;;  %vm359_vm7 = vcmp.eq.f32.partialorder %v348_v58, inf  ;;  %vm361_vm8 = vcmp.eq.f32.partialorder %v348_v58, 0.0  ;;  %v362_v26 = vand.u32 2147483648, %v348_v58 }
 0x198   :  { %v341_v3 = vmul.f32 %v333_v61, %v333_v61  ;;  %v345_v63 = vmul.f32 %v337_v17, %v337_v17  ;;  %vm385_vm11 = vcmp.eq.f32.partialorder %v350_v39, 0.0  ;;  %v386_v28 = vand.u32 2147483648, %v350_v39 }
 0x199   :  { %v351_v7 = vadd.f32 %v347_v22, %v343_v62 }
 0x19a   :  { %v349_v0 = vadd.f32 %v345_v63, %v341_v3 }
 0x19b   :  { %484 = vrsqrt.f32 %v351_v7  ;;  %v481_v53 = vpop.eup %480  ;;  %vm395_vm12 = vcmp.eq.f32.partialorder %v351_v7, inf  ;;  %v398_v41 = vand.u32 2147483648, %v351_v7  ;;  %vm397_vm13 = vcmp.eq.f32.partialorder %v351_v7, 0.0 }
 0x19c   :  { %v483_v23 = vpop.eup %482  ;;  %486 = vrsqrt.f32 %v349_v0  ;;  %v377_v2 = vmul.f32 %v481_v53, %v350_v39  ;;  %vm371_vm14 = vcmp.eq.f32.partialorder %v349_v0, inf  ;;  %v374_v44 = vand.u32 2147483648, %v349_v0 }
 0x19d   :  { %v353_v25 = vmul.f32 %v483_v23, %v348_v58  ;;  %vm373_vm15 = vcmp.eq.f32.partialorder %v349_v0, 0.0 }
 0x19e   :  { %v378_v1 = vmul.f32 %v481_v53, %v377_v2 }
 0x19f   :  { %v354_v36 = vmul.f32 %v483_v23, %v353_v25 }
 0x1a0   :  { %v379_v5 = vmul.f32 0.5, %v378_v1 }
 0x1a1   :  { %v485_v4 = vpop.eup %484  ;;  %v355_v19 = vmul.f32 0.5, %v354_v36 }
 0x1a2   :  { %v389_v56 = vmul.f32 %v485_v4, %v351_v7  ;;  %v487_v6 = vpop.eup %486  ;;  %v380_v10 = vsub.f32 1.5, %v379_v5 }
 0x1a3   :  { %v356_v8 = vsub.f32 1.5, %v355_v19  ;;  %v365_v9 = vmul.f32 %v487_v6, %v349_v0 }
 0x1a4   :  { %v390_v11 = vmul.f32 %v485_v4, %v389_v56  ;;  %v381_v15 = vmul.f32 %v481_v53, %v380_v10 }
 0x1a5   :  { %v357_v12 = vmul.f32 %v483_v23, %v356_v8  ;;  %v366_v14 = vmul.f32 %v487_v6, %v365_v9 }
 0x1a6   :  { %v391_v16 = vmul.f32 0.5, %v390_v11  ;;  %v382_v21 = vmul.f32 %v381_v15, %v350_v39 }
 0x1a7   :  { %v358_v18 = vmul.f32 %v357_v12, %v348_v58  ;;  %v367_v20 = vmul.f32 0.5, %v366_v14 }
 0x1a8   :  { %v392_v24 = vsub.f32 1.5, %v391_v16  ;;  %v384_v30 = vsel %vm383_vm10, %v350_v39, %v382_v21 }
 0x1a9   :  { %v360_v13 = vsel %vm359_vm7, %v348_v58, %v358_v18  ;;  %v368_v29 = vsub.f32 1.5, %v367_v20  ;;  %v387_v37 = vsel %vm385_vm11, %v386_v28, %v384_v30 }
 0x1aa   :  { %v393_v31 = vmul.f32 %v485_v4, %v392_v24  ;;  %v363_v32 = vsel %vm361_vm8, %v362_v26, %v360_v13  ;;  %403 = vst.msk [vmem:[#allocation8 + $0x10] sm:$0xff] %vm400_vm9, %v387_v37 }
 0x1ab   :  { %v369_v38 = vmul.f32 %v487_v6, %v368_v29  ;;  %401 = vst.msk [vmem:[#allocation8] sm:$0xff] %vm400_vm9, %v363_v32 }
 0x1ac   :  { %v394_v40 = vmul.f32 %v393_v31, %v351_v7 }
 0x1ad   :  { %v370_v42 = vmul.f32 %v369_v38, %v349_v0 }
 0x1ae   :  { %v396_v43 = vsel %vm395_vm12, %v351_v7, %v394_v40 }
 0x1af   :  { %v399_v45 = vsel %vm397_vm13, %v398_v41, %v396_v43  ;;  %v372_v46 = vsel %vm371_vm14, %v349_v0, %v370_v42 }
 0x1b0   :  { %404 = vst.msk [vmem:[#allocation8 + $0x18] sm:$0xff] %vm400_vm9, %v399_v45  ;;  %v375_v33 = vsel %vm373_vm15, %v374_v44, %v372_v46 }
 0x1b1   :  { %402 = vst.msk [vmem:[#allocation8 + $0x8] sm:$0xff] %vm400_vm9, %v375_v33 }
 0x1b2   :  { %417 = dma.vmem_to_hbm [thread:$0]  %s410_s4, 512, %s412_s7, [#allocation4], %s592_s18, %s592_s18, %s593_s19  }
 0x1b3   :  { %588 = dma.done.wait [#allocation4], 512  }
 0x1b4   :  { %589 = vsyncadd [#allocation4], 4294966784 }
 0x1b5   :  { %422 = vsyncpa [#allocation3], 1 }
 0x1b6   :  { %423 = vsyncpa [#allocation6], 1 }
 0x1b7   :  { %424 = vsyncpa [#allocation4], 1 }

</bundles_post_ra>
